<compile_context>
chip_gen: v7x
topology: tpu7x:2x2x1
jax: 0.10.0
libtpu: 0.0.40
codegen_flags: <defaults>
</compile_context>

<pallas_src>
import functools

import jax
import jax.numpy as jnp
from jax.experimental import pallas as pl
from jax.experimental.pallas import tpu as pltpu

LANES = 128            # lane (minor) dimension of the flattened view
MAX_BLOCK_ROWS = 2048  # (2048, 128) f32 = 1 MiB per input block
NUM_PARTITIONS = 2     # per-TensorCore partial sums (v7x megacore)


def _round_up(x, m):
    return (x + m - 1) // m * m


def _compose_metric_kernel(out_ref, tgt_ref, mse_ref, mae_ref,
                           acc_mse, acc_mae,
                           *, block_rows, inner, valid_rows):
    p = pl.program_id(0)   # parallel partition (megacore)
    j = pl.program_id(1)   # reduction steps within the partition

    @pl.when(j == 0)
    def _():
        acc_mse[...] = jnp.zeros_like(acc_mse)
        acc_mae[...] = jnp.zeros_like(acc_mae)

    # Logical (unclamped) row offset of this block; rows >= valid_rows are
    # masked out (covers the ragged tail block and fully-OOB blocks of the
    # last, possibly under-full, partition).
    row_offset = (p * inner + j) * block_rows
    row_idx = (jax.lax.broadcasted_iota(jnp.int32, (block_rows, LANES), 0)
               + row_offset)
    mask = row_idx < valid_rows

    d = out_ref[...].astype(jnp.float32) - tgt_ref[...].astype(jnp.float32)
    d = jnp.where(mask, d, 0.0)

    # Per-lane partial sums: sublane reduce per step, keep 128 lanes live.
    acc_mse[...] += jnp.sum(d * d, axis=0, keepdims=True)
    acc_mae[...] += jnp.sum(jnp.abs(d), axis=0, keepdims=True)

    @pl.when(j == pl.num_programs(1) - 1)
    def _():
        mse_ref[0] = acc_mse[...]
        mae_ref[0] = acc_mae[...]


def compose_metric(outputs, targets):
    """Returns {"mse": scalar, "mae": scalar}, reduction='mean' for both."""
    assert outputs.shape == targets.shape
    n = outputs.size

    o = outputs.reshape(-1)
    t = targets.reshape(-1)
    # Only if n is not a multiple of 128 do we pad the (tiny) flat tail with
    # zeros (contributes 0 to both sums).  The common case is a free reshape.
    rem = (-n) % LANES
    if rem:
        o = jnp.pad(o, (0, rem))
        t = jnp.pad(t, (0, rem))
    rows = (n + rem) // LANES
    o2 = o.reshape(rows, LANES)
    t2 = t.reshape(rows, LANES)

    block_rows = min(MAX_BLOCK_ROWS, _round_up(rows, 8))
    total_blocks = pl.cdiv(rows, block_rows)
    num_parts = NUM_PARTITIONS
    inner = pl.cdiv(total_blocks, num_parts)
    last_blk = total_blocks - 1

    def in_map(p, j):
        # Clamp so the DMA never targets a fully out-of-bounds block; the
        # in-kernel row mask zeroes any such block's contribution.
        return (jnp.minimum(p * inner + j, last_blk), 0)

    kernel = functools.partial(
        _compose_metric_kernel,
        block_rows=block_rows, inner=inner, valid_rows=rows)

    itemsize = jnp.dtype(outputs.dtype).itemsize
    mse_p, mae_p = pl.pallas_call(
        kernel,
        out_shape=(
            jax.ShapeDtypeStruct((num_parts, 1, LANES), jnp.float32),
            jax.ShapeDtypeStruct((num_parts, 1, LANES), jnp.float32),
        ),
        grid_spec=pltpu.PrefetchScalarGridSpec(
            num_scalar_prefetch=0,
            grid=(num_parts, inner),
            in_specs=[
                pl.BlockSpec((block_rows, LANES), in_map),
                pl.BlockSpec((block_rows, LANES), in_map),
            ],
            out_specs=[
                pl.BlockSpec((1, 1, LANES), lambda p, j: (p, 0, 0)),
                pl.BlockSpec((1, 1, LANES), lambda p, j: (p, 0, 0)),
            ],
            scratch_shapes=[
                pltpu.VMEM((1, LANES), jnp.float32),
                pltpu.VMEM((1, LANES), jnp.float32),
            ],
        ),
        compiler_params=pltpu.CompilerParams(
            dimension_semantics=("parallel", "arbitrary")),
        cost_estimate=pl.CostEstimate(
            flops=5 * n,
            transcendentals=0,
            bytes_accessed=2 * n * itemsize + 2 * num_parts * LANES * 4),
    )(o2, t2)

    inv_n = jnp.float32(1.0 / n)  # reduction='mean' for both metrics
    return {
        "mse": jnp.sum(mse_p) * inv_n,
        "mae": jnp.sum(mae_p) * inv_n,
    }


# Exposed for parity with ComposeMetric.reduction
REDUCTION = {"mse": "mean", "mae": "mean"}


if __name__ == "__main__":
    key = jax.random.PRNGKey(0)
    k1, k2 = jax.random.split(key)
    # NCHW like PyTorch: batch=2, channels=4, spatial=16x16
    outputs = jax.random.normal(k1, (2, 4, 16, 16), dtype=jnp.float32)
    targets = jax.random.normal(k2, (2, 4, 16, 16), dtype=jnp.float32)

    result = compose_metric(outputs, targets)
    jax.block_until_ready(result)

    # Reference check in plain JAX.
    ref_mse = jnp.mean((outputs - targets) ** 2)
    ref_mae = jnp.mean(jnp.abs(outputs - targets))
    assert jnp.allclose(result["mse"], ref_mse, rtol=1e-5, atol=1e-6), (
        result["mse"], ref_mse)
    assert jnp.allclose(result["mae"], ref_mae, rtol=1e-5, atol=1e-6), (
        result["mae"], ref_mae)

    print("KERNEL_OK")
</pallas_src>

<mosaic_0001>
module attributes {stable_mosaic.version = 11 : i64} {
  func.func @_compose_metric_kernel(%arg0: i32, %arg1: i32, %arg2: memref<16x128xf32, #tpu.memory_space<vmem>>, %arg3: memref<16x128xf32, #tpu.memory_space<vmem>>, %arg4: memref<1x1x128xf32, #tpu.memory_space<vmem>>, %arg5: memref<1x1x128xf32, #tpu.memory_space<vmem>>, %arg6: memref<1x128xf32, #tpu.memory_space<vmem>>, %arg7: memref<1x128xf32, #tpu.memory_space<vmem>>) attributes {dimension_semantics = [#tpu.dimension_semantics<parallel>, #tpu.dimension_semantics<arbitrary>], iteration_bounds = array<i64: 2, 1>, scalar_prefetch = 0 : i64, scratch_operands = 2 : i64, tpu.core_type = #tpu.core_type<tc>, window_params = [{transform_indices = @transform_0, window_bounds = array<i64: 16, 128>}, {transform_indices = @transform_1, window_bounds = array<i64: 16, 128>}, {transform_indices = @transform_2, window_bounds = array<i64: 1, 1, 128>}, {transform_indices = @transform_3, window_bounds = array<i64: 1, 1, 128>}]} {
    %c0_i32 = arith.constant 0 : i32
    %0 = arith.cmpi eq, %arg1, %c0_i32 : i32
    %1 = arith.extui %0 : i1 to i32
    %c0_i32_0 = arith.constant 0 : i32
    %2 = arith.cmpi ne, %1, %c0_i32_0 : i32
    scf.if %2 {
      %cst_17 = arith.constant 0.000000e+00 : f32
      %31 = vector.broadcast %cst_17 : f32 to vector<1x128xf32>
      %c0_18 = arith.constant 0 : index
      %c0_19 = arith.constant 0 : index
      %32 = vector.load %arg6[%c0_18, %c0_19] : memref<1x128xf32, #tpu.memory_space<vmem>>, vector<1x128xf32>
      tpu.vector_store %arg6[%c0_18, %c0_19], %31 {strides = array<i32>} : memref<1x128xf32, #tpu.memory_space<vmem>>, vector<1x128xf32>,
      %cst_20 = arith.constant 0.000000e+00 : f32
      %33 = vector.broadcast %cst_20 : f32 to vector<1x128xf32>
      %c0_21 = arith.constant 0 : index
      %c0_22 = arith.constant 0 : index
      %34 = vector.load %arg7[%c0_21, %c0_22] : memref<1x128xf32, #tpu.memory_space<vmem>>, vector<1x128xf32>
      tpu.vector_store %arg7[%c0_21, %c0_22], %33 {strides = array<i32>} : memref<1x128xf32, #tpu.memory_space<vmem>>, vector<1x128xf32>,
    } else {
    }
    %c1_i32 = arith.constant 1 : i32
    %3 = arith.muli %arg0, %c1_i32 : i32
    %4 = arith.addi %3, %arg1 : i32
    %c16_i32 = arith.constant 16 : i32
    %5 = arith.muli %4, %c16_i32 : i32
    %6 = tpu.iota {dimensions = array<i32: 0>} : vector<16x128xi32>
    %7 = vector.broadcast %5 : i32 to vector<16x128xi32>
    %8 = arith.addi %6, %7 : vector<16x128xi32>
    %c16_i32_1 = arith.constant 16 : i32
    %9 = vector.broadcast %c16_i32_1 : i32 to vector<16x128xi32>
    %10 = arith.cmpi slt, %8, %9 : vector<16x128xi32>
    %c0 = arith.constant 0 : index
    %c0_2 = arith.constant 0 : index
    %11 = vector.load %arg2[%c0, %c0_2] : memref<16x128xf32, #tpu.memory_space<vmem>>, vector<16x128xf32>
    %c0_3 = arith.constant 0 : index
    %c0_4 = arith.constant 0 : index
    %12 = vector.load %arg3[%c0_3, %c0_4] : memref<16x128xf32, #tpu.memory_space<vmem>>, vector<16x128xf32>
    %13 = arith.subf %11, %12 : vector<16x128xf32>
    %cst = arith.constant 0.000000e+00 : f32
    %14 = vector.broadcast %cst : f32 to vector<16x128xf32>
    %15 = arith.select %10, %13, %14 : vector<16x128xi1>, vector<16x128xf32>
    %c0_5 = arith.constant 0 : index
    %c0_6 = arith.constant 0 : index
    %16 = vector.load %arg6[%c0_5, %c0_6] : memref<1x128xf32, #tpu.memory_space<vmem>>, vector<1x128xf32>
    %17 = arith.mulf %15, %15 : vector<16x128xf32>
    %cst_7 = arith.constant dense<0.000000e+00> : vector<128xf32>
    %18 = vector.multi_reduction <add>, %17, %cst_7 [0] : vector<16x128xf32> to vector<128xf32>
    %19 = vector.shape_cast %18 : vector<128xf32> to vector<1x128xf32>
    %20 = arith.addf %16, %19 : vector<1x128xf32>
    %c0_8 = arith.constant 0 : index
    %c0_9 = arith.constant 0 : index
    %21 = vector.load %arg6[%c0_8, %c0_9] : memref<1x128xf32, #tpu.memory_space<vmem>>, vector<1x128xf32>
    tpu.vector_store %arg6[%c0_8, %c0_9], %20 {strides = array<i32>} : memref<1x128xf32, #tpu.memory_space<vmem>>, vector<1x128xf32>,
    %c0_10 = arith.constant 0 : index
    %c0_11 = arith.constant 0 : index
    %22 = vector.load %arg7[%c0_10, %c0_11] : memref<1x128xf32, #tpu.memory_space<vmem>>, vector<1x128xf32>
    %23 = math.absf %15 : vector<16x128xf32>
    %cst_12 = arith.constant dense<0.000000e+00> : vector<128xf32>
    %24 = vector.multi_reduction <add>, %23, %cst_12 [0] : vector<16x128xf32> to vector<128xf32>
    %25 = vector.shape_cast %24 : vector<128xf32> to vector<1x128xf32>
    %26 = arith.addf %22, %25 : vector<1x128xf32>
    %c0_13 = arith.constant 0 : index
    %c0_14 = arith.constant 0 : index
    %27 = vector.load %arg7[%c0_13, %c0_14] : memref<1x128xf32, #tpu.memory_space<vmem>>, vector<1x128xf32>
    tpu.vector_store %arg7[%c0_13, %c0_14], %26 {strides = array<i32>} : memref<1x128xf32, #tpu.memory_space<vmem>>, vector<1x128xf32>,
    %c0_i32_15 = arith.constant 0 : i32
    %28 = arith.cmpi eq, %arg1, %c0_i32_15 : i32
    %29 = arith.extui %28 : i1 to i32
    %c0_i32_16 = arith.constant 0 : i32
    %30 = arith.cmpi ne, %29, %c0_i32_16 : i32
    scf.if %30 {
      %c0_17 = arith.constant 0 : index
      %c0_18 = arith.constant 0 : index
      %31 = vector.load %arg6[%c0_17, %c0_18] : memref<1x128xf32, #tpu.memory_space<vmem>>, vector<1x128xf32>
      %c0_19 = arith.constant 0 : index
      %c0_20 = arith.constant 0 : index
      %c0_21 = arith.constant 0 : index
      %32 = vector.load %arg4[%c0_19, %c0_20, %c0_21] : memref<1x1x128xf32, #tpu.memory_space<vmem>>, vector<1x1x128xf32>
      %33 = vector.shape_cast %32 : vector<1x1x128xf32> to vector<1x128xf32>
      %34 = vector.shape_cast %31 : vector<1x128xf32> to vector<1x1x128xf32>
      tpu.vector_store %arg4[%c0_19, %c0_20, %c0_21], %34 {strides = array<i32>} : memref<1x1x128xf32, #tpu.memory_space<vmem>>, vector<1x1x128xf32>,
      %c0_22 = arith.constant 0 : index
      %c0_23 = arith.constant 0 : index
      %35 = vector.load %arg7[%c0_22, %c0_23] : memref<1x128xf32, #tpu.memory_space<vmem>>, vector<1x128xf32>
      %c0_24 = arith.constant 0 : index
      %c0_25 = arith.constant 0 : index
      %c0_26 = arith.constant 0 : index
      %36 = vector.load %arg5[%c0_24, %c0_25, %c0_26] : memref<1x1x128xf32, #tpu.memory_space<vmem>>, vector<1x1x128xf32>
      %37 = vector.shape_cast %36 : vector<1x1x128xf32> to vector<1x128xf32>
      %38 = vector.shape_cast %35 : vector<1x128xf32> to vector<1x1x128xf32>
      tpu.vector_store %arg5[%c0_24, %c0_25, %c0_26], %38 {strides = array<i32>} : memref<1x1x128xf32, #tpu.memory_space<vmem>>, vector<1x1x128xf32>,
    } else {
    }
    return
  }
  func.func @transform_0(%arg0: i32, %arg1: i32) -> (i32, i32) {
    %c1_i32 = arith.constant 1 : i32
    %0 = arith.muli %arg0, %c1_i32 : i32
    %1 = arith.addi %0, %arg1 : i32
    %c0_i32 = arith.constant 0 : i32
    %2 = arith.minsi %1, %c0_i32 : i32
    %c0_i32_0 = arith.constant 0 : i32
    %c0_i32_1 = arith.constant 0 : i32
    return %2, %c0_i32_0 : i32, i32
  }
  func.func @transform_1(%arg0: i32, %arg1: i32) -> (i32, i32) {
    %c1_i32 = arith.constant 1 : i32
    %0 = arith.muli %arg0, %c1_i32 : i32
    %1 = arith.addi %0, %arg1 : i32
    %c0_i32 = arith.constant 0 : i32
    %2 = arith.minsi %1, %c0_i32 : i32
    %c0_i32_0 = arith.constant 0 : i32
    %c0_i32_1 = arith.constant 0 : i32
    return %2, %c0_i32_0 : i32, i32
  }
  func.func @transform_2(%arg0: i32, %arg1: i32) -> (i32, i32, i32) {
    %c0_i32 = arith.constant 0 : i32
    %c0_i32_0 = arith.constant 0 : i32
    %c0_i32_1 = arith.constant 0 : i32
    return %arg0, %c0_i32, %c0_i32_0 : i32, i32, i32
  }
  func.func @transform_3(%arg0: i32, %arg1: i32) -> (i32, i32, i32) {
    %c0_i32 = arith.constant 0 : i32
    %c0_i32_0 = arith.constant 0 : i32
    %c0_i32_1 = arith.constant 0 : i32
    return %arg0, %c0_i32, %c0_i32_0 : i32, i32, i32
  }
}

</mosaic_0001>

<bundles_post_ra>
// kernel: tpu_custom_call.1
= control target key start
LH: loop header
LB: loop body
LE: loop exit
PB: predicated region body
PF: predicated region fallthrough
CT: control target
= control target key end

     0   :  { %9 = vsyncpa [#allocation5], 0  ;;  %s1075_s0 = inlined_call_operand.hbm [shape: f32[16,128], index: 0, kind: input, shape index: {}]   ;;  %s1076_s1 = inlined_call_operand.hbm [shape: f32[16,128], index: 1, kind: input, shape index: {}]   ;;  %s1077_s2 = inlined_call_operand.hbm [shape: f32[2,1,128], index: 2, kind: output, shape index: {0}]   ;;  %s1078_s3 = inlined_call_operand.hbm [shape: f32[2,1,128], index: 3, kind: output, shape index: {1}]  }
   0x1   :  { %11 = vsyncpa [#allocation5 + $0x1], 0 }
   0x2   :  { %12 = vsyncpa [#allocation8], 0 }
   0x3   :  { %14 = vsyncpa [#allocation8 + $0x1], 0 }
   0x4   :  { %15 = vsyncpa [#allocation6], 0 }
   0x5   :  { %17 = vsyncpa [#allocation6 + $0x1], 0 }
   0x6   :  { %18 = vsyncpa [#allocation11], 0 }
   0x7   :  { %20 = vsyncpa [#allocation11 + $0x1], 0  ;;  %s833_s12 = smov 0   ;;  %s835_s13 = smov 0  }
   0x8   :  { %s837_s14 = smov 0   ;;  %s839_s15 = smov 0  }
   0x9   :  { %s841_s16 = smov 0   ;;  %s843_s17 = smov 0  }
   0xa   :  { %s845_s18 = smov 0   ;;  %s847_s19 = smov 0  }
   0xb LB: > { %s486_s20 = sadd.s32 4294967295, %s804_s19   ;;  %s487_s21 = sadd.s32 4294967294, %s804_s19   ;;  %s804_s19 = sphi %s847_s19, %s26_s19   ;;  %s800_s18 = sphi %s845_s18, %s1097_s18   ;;  %s796_s17 = sphi %s843_s17, %s1096_s17   ;;  %s792_s16 = sphi %s841_s16, %s1065_s16   ;;  %s788_s15 = sphi %s839_s15, %s1095_s15   ;;  %s784_s14 = sphi %s837_s14, %s1094_s14   ;;  %s780_s13 = sphi %s835_s13, %s1093_s13   ;;  %s776_s12 = sphi %s833_s12, %s1092_s12  }
   0xc   : > { %s38_s22 = sadd.s32 1, %s800_s18  ;;  %p773_p1 = scmp.ne.s32.totalorder %s792_s16, 0 }
   0xd   : > { %p40_p0 = scmp.ge.s32.totalorder %s38_s22, 2  ;;  %p59_p2 = scmp.eq.s32.totalorder %s804_s19, 0 }
   0xe   : > { %p64_p3 = scmp.ne.s32.totalorder %s792_s16, %s788_s15  ;;  %p65_p5 = scmp.eq.s32.totalorder %s486_s20, 0 }
   0xf   : > { %s1099_s22 = smov (%p40_p0, %s38_s22), 0  ;;  %p879_p4 = por %p773_p1, %p59_p2 }
  0x10   : > { %p883_p6 = por %p65_p5, %p64_p3  ;;  %s106_s25 = ssub.s32 %s800_s18, %s1099_s22 }
  0x11   : > { %p107_p7 = scmp.eq.s32.totalorder %s106_s25, 0  ;;  %s109_s26 = sadd.s32 1, %s784_s14 }
  0x12   : > { %s1082_s24 = scalar_select %p883_p6, 1, 0 }
  0x13   : > { %s891_s27 = scalar_select %p107_p7, %s784_s14, %s109_s26  }
  0x14   : > { %p119_p8 = scmp.ne.s32.totalorder %s784_s14, %s780_s13  ;;  %p120_p9 = scmp.eq.s32.totalorder %s486_s20, 1 }
  0x15   : > { %p125_p10 = scmp.ne.s32.totalorder %s780_s13, %s776_s12  ;;  %p126_p11 = scmp.eq.s32.totalorder %s487_s21, 1 }
  0x16   : > { %p897_p12 = por %p120_p9, %p119_p8  ;;  %p528_p1 = scmp.lt.s32.totalorder %s804_s19, 2 }
  0x17   : > { %p902_p0 = por %p126_p11, %p125_p10  ;;  %s806_s30 = smov [#allocation4]  }
  0x18   : > { %s1083_s28 = scalar_select %p897_p12, 1, 0 }
  0x19   : > { %s1084_s29 = scalar_select %p902_p0, 1, 0 }
  0x1a   : > { %s186_s4 = sshll.u32 %s806_s30, 4  ;;  %p909_p2 = pnand %p528_p1, %p879_p4  ;;  %s187_s4 = int_to_ptr.vmem [resolvable:$true] %s186_s4 }
  0x1b   : > { %s605_s8 = scalar_lea.hbm %s1075_s0, 256 }
  0x1c   : > { %p606_p3 = scmp.ne.s32.totalorder %s1075_s0, %s605_s8  ;;  %p607_p5 = pneg %p909_p2 }
  0x1d   : > { %p612_p8 = scmp.lt.u32.totalorder %s605_s8, %s605_s8  ;;  %p614_p9 = scmp.lt.u32.totalorder %s605_s8, %s1075_s0 }
  0x1e   : > { %p608_p7 = pnand %p607_p5, %p606_p3 }
  0x1f   : > { %p615_p10 = por %p614_p9, %p612_p8 }
  0x20   : > { %p609_p4 = pneg %p608_p7 }
  0x22   : > { %p616_p11 = pnand %p615_p10, %p609_p4 }
  0x24   : > { %619 = shalt.err (!%p616_p11)
}
  0x25   : > { %s620_s20 = scalar_lea.vmem %s187_s4, 256  ;;  %s627_s21 = scalar_lea.vmem %s187_s4, 512 }
  0x26   : > { %p621_p1 = scmp.ne.s32.totalorder %s187_s4, %s620_s20  ;;  %p628_p12 = scmp.lt.s32.totalorder %s187_s4, %s187_s4 }
  0x27   : > { %p629_p6 = scmp.lt.s32.totalorder %s627_s21, %s620_s20 }
  0x28   : > { %p623_p13 = pnand %p621_p1, %p607_p5 }
  0x29   : > { %p630_p3 = por %p629_p6, %p628_p12 }
  0x2a   : > { %p624_p0 = pneg %p623_p13 }
  0x2c   : > { %p631_p7 = pnand %p630_p3, %p624_p0 }
  0x2e   : > { %634 = shalt.err (!%p631_p7)
}
  0x2f   : > { %s807_s23 = smov 128   ;;  %s808_s25 = smov 8  }
  0x30   : > { %517 = dma.hbm_to_vmem [thread:$0]  (!%p909_p2), %s1075_s0, 256, %s187_s4, [#allocation5], %s807_s23, %s807_s23, %s808_s25  }
  0x31   : > { %p496_p13 = scmp.ge.s32.totalorder %s804_s19, 1  ;;  %p218_p4 = scmp.lt.s32.totalorder %s804_s19, 3 }
  0x32   : > { %s809_s7 = smov [#allocation7]   ;;  %s635_s11 = scalar_lea.hbm %s1076_s1, 256 }
  0x33   : > { %p940_p8 = pnand %p496_p13, %p218_p4  ;;  %s210_s8 = sshll.u32 %s809_s7, 4  ;;  %s211_s8 = int_to_ptr.vmem [resolvable:$true] %s210_s8 }
  0x34   : > { %p636_p6 = scmp.ne.s32.totalorder %s1076_s1, %s635_s11  ;;  %p642_p9 = scmp.lt.u32.totalorder %s635_s11, %s635_s11 }
  0x35   : > { %s1086_s6 = scalar_select %p940_p8, 1, 0 }
  0x36   : > { %p638_p12 = pnand %p636_p6, %p607_p5  ;;  %p644_p10 = scmp.lt.u32.totalorder %s635_s11, %s1076_s1 }
  0x38   : > { %p639_p0 = pneg %p638_p12  ;;  %p645_p11 = por %p644_p10, %p642_p9 }
  0x3a   : > { %p646_p1 = pnand %p645_p11, %p639_p0 }
  0x3c   : > { %649 = shalt.err (!%p646_p1)
}
  0x3d   : > { %s650_s26 = scalar_lea.vmem %s211_s8, 256  ;;  %s657_s30 = scalar_lea.vmem %s211_s8, 512 }
  0x3e   : > { %p651_p3 = scmp.ne.s32.totalorder %s211_s8, %s650_s26  ;;  %p658_p4 = scmp.lt.s32.totalorder %s211_s8, %s211_s8 }
  0x3f   : > { %p659_p8 = scmp.lt.s32.totalorder %s657_s30, %s650_s26 }
  0x40   : > { %p653_p7 = pnand %p651_p3, %p607_p5 }
  0x41   : > { %p660_p6 = por %p659_p8, %p658_p4 }
  0x42   : > { %p654_p13 = pneg %p653_p7 }
  0x44   : > { %p661_p12 = pnand %p660_p6, %p654_p13 }
  0x46   : > { %664 = shalt.err (!%p661_p12)
}
  0x47   : > { %520 = dma.hbm_to_vmem [thread:$0]  (!%p909_p2), %s1076_s1, 256, %s211_s8, [#allocation8], %s807_s23, %s807_s23, %s808_s25  }
  0x48   : > { %p1087_p0 = scmp.ne.s32.totalorder %s1086_s6, 0 }
  0x49   : > { %s224_s10 = sand.u32 (!%p1087_p0), 1, %s792_s16   ;;  %p1088_p5 = scmp.ne.s32.totalorder (!%p1087_p0), %s1082_s24, 0 }
  0x4a   : > { %222 = sbr.rel (%p1087_p0) target bundleno = 157 (0x9d), region = 28  ;;  %s497_s11 = sshll.u32 (!%p1087_p0), %s224_s10, 4 }
  0x4b   : > { %s225_s15 = scalar_lea.sflag (!%p1087_p0), [#allocation5], %s224_s10  ;;  %s228_s20 = scalar_lea.vmem (!%p1087_p0), [#allocation4], %s497_s11 }
  0x51   : > { %758 = dma.done.wait (%p1088_p5), %s225_s15, 256  }
  0x52   : > { %760 = vsyncadd (%p1088_p5), %s225_s15, 4294967040  ;;  %s234_s5 = scalar_lea.sflag [#allocation8], %s224_s10  ;;  %s237_s4 = scalar_lea.vmem [#allocation7], %s497_s11 }
  0x53   : > { %762 = dma.done.wait (%p1088_p5), %s234_s5, 256  }
  0x54   : > { %764 = vsyncadd (%p1088_p5), %s234_s5, 4294967040  ;;  %s979_s23 = sshll.u32 %s796_s17, 4  ;;  %v284_v0 = vlaneseq  ;;  %v810_v1 = vmov 0.0   ;;  %v292_v7 = vld [vmem:[%s228_s20] sm:$0xff]  ;;  %v293_v8 = vld [vmem:[%s228_s20 + $0x8] sm:$0xff]  ;;  %s983_s17 = sand.u32 1, %s780_s13  }
  0x55   : > { %280 = vst [vmem:[#allocation2] sm:$0x1] %v810_v1  ;;  %281 = vst [vmem:[#allocation3] sm:$0x1] %v810_v1  ;;  %v287_v2 = vstv %s979_s23  ;;  %v294_v9 = vld [vmem:[%s237_s4] sm:$0xff]  ;;  %v295_v10 = vld [vmem:[%s237_s4 + $0x8] sm:$0xff]  ;;  %s995_s30 = scalar_lea.hbm %s1077_s2, %s979_s23  ;;  %s1001_s10 = scalar_lea.hbm %s1078_s3, %s979_s23 }
  0x56   : > { %v285_v3 = vshrl.u32 %v284_v0, 7  ;;  %v296_v11 = vsub.f32 %v292_v7, %v294_v9  ;;  %v297_v12 = vsub.f32 %v293_v8, %v295_v10  ;;  %s261_s24 = scalar_lea.vmem [#allocation9], %s983_s17  ;;  %s267_s6 = scalar_lea.vmem [#allocation10], %s983_s17 }
  0x57   : > { %s348_s25 = sshll.u32 %s261_s24, 4  ;;  %s361_s8 = sshll.u32 %s267_s6, 4  ;;  %s987_s25 = int_to_ptr.vmem [resolvable:$true] %s348_s25  ;;  %s989_s8 = int_to_ptr.vmem [resolvable:$true] %s361_s8 }
  0x58   : > { %v286_v4 = vadd.s32 8, %v285_v3  ;;  %v288_v5 = vadd.s32 %v287_v2, %v285_v3  ;;  %s332_s11 = scalar_lea.sflag [#allocation6], %s983_s17  ;;  %s665_s15 = scalar_lea.vmem %s987_s25, 16 }
  0x59   : > { %p666_p2 = scmp.ne.s32.totalorder %s987_s25, %s665_s15  ;;  %p1089_p8 = scmp.ne.s32.totalorder %s1083_s28, 0 }
  0x5a   : > { %v289_v6 = vadd.s32 %v287_v2, %v286_v4  ;;  %vm290_vm0 = vcmp.lt.s32.totalorder %v288_v5, 16  ;;  %s811_s20 = smov [#allocation9]  }
  0x5b   : > { %v298_v13 = vsel %vm290_vm0, %v296_v11, 0.0  ;;  %p667_p9 = pnand %p666_p2, %p1089_p8  ;;  %s669_s5 = sshll.u32 %s811_s20, 4  ;;  %s670_s5 = int_to_ptr.vmem [resolvable:$false] %s669_s5 }
  0x5c   : > { %vm291_vm1 = vcmp.lt.s32.totalorder %v289_v6, 16  ;;  %v301_v15 = vmul.f32 %v298_v13, %v298_v13  ;;  %v313_v16 = vand.u32 2147483647, %v298_v13  ;;  %v300_v31 = vld [vmem:[#allocation2] sm:$0x1]  ;;  %s671_s4 = scalar_lea.vmem %s670_s5, 32  ;;  %p672_p11 = scmp.lt.s32.totalorder %s987_s25, %s670_s5 }
  0x5d   : > { %v299_v14 = vsel %vm291_vm1, %v297_v12, 0.0  ;;  %v312_v32 = vld [vmem:[#allocation3] sm:$0x1]  ;;  %p668_p10 = pneg %p667_p9  ;;  %p673_p1 = scmp.lt.s32.totalorder %s671_s4, %s665_s15 }
  0x5e   : > { %v302_v17 = vmul.f32 %v299_v14, %v299_v14  ;;  %v314_v18 = vand.u32 2147483647, %v299_v14 }
  0x5f   : > { %p674_p3 = por %p673_p1, %p672_p11 }
  0x60   : > { %v303_v19 = vadd.f32 %v302_v17, %v301_v15  ;;  %v315_v20 = vadd.f32 %v314_v18, %v313_v16 }
  0x61   : > { %p675_p7 = pnand %p674_p3, %p668_p10 }
  0x62   : > { %v304_v21 = vrot.slane %v303_v19, 4  ;;  %v316_v22 = vrot.slane %v315_v20, 4 }
  0x64   : > { %v305_v23 = vadd.f32 %v304_v21, %v303_v19  ;;  %v317_v24 = vadd.f32 %v316_v22, %v315_v20 }
  0x66   : > { %v306_v25 = vrot.slane %v305_v23, 2  ;;  %v318_v26 = vrot.slane %v317_v24, 2 }
  0x68   : > { %v307_v27 = vadd.f32 %v306_v25, %v305_v23  ;;  %v319_v28 = vadd.f32 %v318_v26, %v317_v24 }
  0x6a   : > { %v308_v29 = vrot.slane %v307_v27, 1  ;;  %v320_v30 = vrot.slane %v319_v28, 1 }
  0x6c   : > { %v309_v33 = vadd.f32 %v308_v29, %v307_v27  ;;  %v321_v34 = vadd.f32 %v320_v30, %v319_v28 }
  0x6e   : > { %v310_v35 = vadd.f32 %v309_v33, %v300_v31  ;;  %v322_v36 = vadd.f32 %v321_v34, %v312_v32 }
  0x70   : > { %311 = vst [vmem:[#allocation2] sm:$0x1] %v310_v35  ;;  %323 = vst [vmem:[#allocation3] sm:$0x1] %v322_v36 }
  0x77   : > { %v327_v37 = vld [vmem:[#allocation2] sm:$0x1]  ;;  %v329_v38 = vld [vmem:[#allocation3] sm:$0x1] }
  0x78   : > { %328 = vst [vmem:[%s261_s24] sm:$0x1] %v327_v37  ;;  %330 = vst [vmem:[%s267_s6] sm:$0x1] %v329_v38 }
  0x79   : > { %678 = shalt.err (!%p675_p7)
}
  0x7a   : > { %s679_s23 = scalar_lea.hbm %s995_s30, 16  ;;  %s683_s21 = scalar_lea.hbm %s1077_s2, 32 }
  0x7b   : > { %p680_p13 = scmp.ne.s32.totalorder %s995_s30, %s679_s23  ;;  %p684_p12 = scmp.lt.u32.totalorder %s995_s30, %s1077_s2 }
  0x7c   : > { %p685_p0 = scmp.lt.u32.totalorder %s683_s21, %s679_s23  ;;  %p687_p2 = scmp.lt.u32.totalorder %s679_s23, %s995_s30 }
  0x7d   : > { %p681_p4 = pnand %p680_p13, %p1089_p8 }
  0x7e   : > { %p686_p5 = por %p685_p0, %p684_p12 }
  0x7f   : > { %p682_p6 = pneg %p681_p4 }
  0x80   : > { %p688_p9 = por %p687_p2, %p686_p5 }
  0x82   : > { %p689_p10 = pnand %p688_p9, %p682_p6 }
  0x84   : > { %692 = shalt.err (!%p689_p10)
}
  0x85   : > { %510 = dma.vmem_to_hbm [thread:$0]  (%p1089_p8), %s987_s25, 16, %s995_s30, %s332_s11  }
  0x86   : > { %s336_s9 = scalar_lea.sflag [#allocation11], %s983_s17  ;;  %s693_s15 = scalar_lea.vmem %s989_s8, 16 }
  0x87   : > { %p694_p11 = scmp.ne.s32.totalorder %s989_s8, %s693_s15  ;;  %s812_s20 = smov [#allocation10]  }
  0x88   : > { %s697_s5 = sshll.u32 %s812_s20, 4  ;;  %s698_s5 = int_to_ptr.vmem [resolvable:$false] %s697_s5 }
  0x89   : > { %p695_p1 = pnand %p694_p11, %p1089_p8  ;;  %s699_s4 = scalar_lea.vmem %s698_s5, 32 }
  0x8a   : > { %p700_p7 = scmp.lt.s32.totalorder %s989_s8, %s698_s5  ;;  %p701_p13 = scmp.lt.s32.totalorder %s699_s4, %s693_s15 }
  0x8b   : > { %p696_p3 = pneg %p695_p1 }
  0x8c   : > { %p702_p4 = por %p701_p13, %p700_p7 }
  0x8e   : > { %p703_p6 = pnand %p702_p4, %p696_p3 }
  0x90   : > { %706 = shalt.err (!%p703_p6)
}
  0x91   : > { %s707_s17 = scalar_lea.hbm %s1001_s10, 16  ;;  %s711_s11 = scalar_lea.hbm %s1078_s3, 32 }
  0x92   : > { %p708_p12 = scmp.ne.s32.totalorder %s1001_s10, %s707_s17  ;;  %p712_p2 = scmp.lt.u32.totalorder %s1001_s10, %s1078_s3 }
  0x93   : > { %p713_p9 = scmp.lt.u32.totalorder %s711_s11, %s707_s17  ;;  %p715_p11 = scmp.lt.u32.totalorder %s707_s17, %s1001_s10 }
  0x94   : > { %p709_p0 = pnand %p708_p12, %p1089_p8 }
  0x95   : > { %p714_p10 = por %p713_p9, %p712_p2 }
  0x96   : > { %p710_p5 = pneg %p709_p0 }
  0x97   : > { %p716_p1 = por %p715_p11, %p714_p10 }
  0x99   : > { %p717_p3 = pnand %p716_p1, %p710_p5 }
  0x9b   : > { %720 = shalt.err (!%p717_p3)
}
  0x9c   : > { %511 = dma.vmem_to_hbm [thread:$0]  (%p1089_p8), %s989_s8, 16, %s1001_s10, %s336_s9  }
  0x9d PF: > { %s373_s6 = sand.u32 1, %s776_s12   ;;  %p1090_p7 = scmp.ne.s32.totalorder %s1084_s29, 0 }
  0x9e   : > { %p1091_p13 = scmp.ge.s32.totalorder %s804_s19, 2  ;;  %s374_s21 = scalar_lea.sflag [#allocation6], %s373_s6 }
  0xa0   : > { %p522_p4 = pnand %p1091_p13, %p1090_p7 }
  0xa2   : > { %766 = dma.done.wait (!%p522_p4), %s374_s21, 16  }
  0xa3   : > { %768 = vsyncadd (!%p522_p4), %s374_s21, 4294967280  ;;  %s382_s26 = scalar_lea.sflag [#allocation11], %s373_s6 }
  0xa4   : > { %770 = dma.done.wait (!%p522_p4), %s382_s26, 16  }
  0xa5   : > { %772 = vsyncadd (!%p522_p4), %s382_s26, 4294967280  ;;  %s26_s19 = sadd.s32 1, %s804_s19   ;;  %s1092_s12 = smov %s780_s13 }
  0xa6   : > { %p23_p6 = scmp.ge.s32.totalorder %s26_s19, 4   ;;  %s1093_s13 = smov %s784_s14 }
  0xa7   : > { %s1094_s14 = smov %s891_s27  ;;  %s1095_s15 = smov %s792_s16 }
  0xa8   : > { %s1065_s16 = smov 0   ;;  %s1096_s17 = smov %s800_s18 }
  0xa9   : > { %s1097_s18 = smov %s1099_s22  ;;  %25 = sbr.rel (!%p23_p6) target bundleno = 11 (0xb), region = 111 }
  0xb0   :  { %386 = vsyncpa [#allocation5], 1 }
  0xb1   :  { %388 = vsyncpa [#allocation5 + $0x1], 1 }
  0xb2   :  { %389 = vsyncpa [#allocation8], 1 }
  0xb3   :  { %391 = vsyncpa [#allocation8 + $0x1], 1 }
  0xb4   :  { %392 = vsyncpa [#allocation6], 1 }
  0xb5   :  { %394 = vsyncpa [#allocation6 + $0x1], 1 }
  0xb6   :  { %395 = vsyncpa [#allocation11], 1 }
  0xb7   :  { %397 = vsyncpa [#allocation11 + $0x1], 1 }

</bundles_post_ra>
